<compile_context>
chip_gen: v7x
topology: tpu7x:2x2x1
jax: 0.10.0
libtpu: 0.0.40
codegen_flags: <defaults>
</compile_context>

<pallas_src>
import jax
import jax.numpy as jnp
import numpy as np
from jax.experimental import pallas as pl
from jax.experimental.pallas import tpu as pltpu

LANE = 128
SUBLANE = 8


def _round_up(x, m):
    return ((x + m - 1) // m) * m


# ----------------------------------------------------------------------------
# Kernel
# ----------------------------------------------------------------------------
def mlp_kernel(x_ref, w1_ref, c1_ref, w2_ref, c2_ref, wo_ref, bo_ref, o_ref):
    # Hidden layer 1: bf16 MXU dot (f32 accumulate); BN(eval)+bias folded into (w1, c1);
    # add + ReLU stay in f32 (v5e has no bf16 VPU).
    h = jnp.dot(x_ref[...], w1_ref[...], preferred_element_type=jnp.float32)
    h = jnp.maximum(h + c1_ref[...], 0.0)

    # Hidden layer 2: same structure (cast only the dot inputs back to bf16).
    h = jnp.dot(h.astype(jnp.bfloat16), w2_ref[...], preferred_element_type=jnp.float32)
    h = jnp.maximum(h + c2_ref[...], 0.0)

    # Output layer: wo/bo are lane-padded to 128 for the MXU, but only the real
    # output columns are written back (avoids 16x padded HBM writeback).
    y = jnp.dot(h.astype(jnp.bfloat16), wo_ref[...], preferred_element_type=jnp.float32)
    y = y + bo_ref[...]
    o_ref[...] = y[:, : o_ref.shape[1]]


# ----------------------------------------------------------------------------
# Wrapper
# ----------------------------------------------------------------------------
def feedforward_nn_pallas(x, folded, output_size, *, tile_b=1024):
    """x: (B, input_size) f32. folded: dict from fold_params(). Returns (B, output_size) f32."""
    B, in_size = x.shape
    h1p = folded["w1"].shape[1]
    h2p = folded["w2"].shape[1]
    out_pad = folded["wo"].shape[1]  # lane-padded to a multiple of 128

    # Batch tiling: tile must be a multiple of 8 sublanes (unconditionally enforced).
    tile_b = _round_up(max(SUBLANE, min(tile_b, _round_up(B, SUBLANE))), SUBLANE)
    # Prefer >=2 grid steps so the "parallel" batch axis can shard across v7x's two
    # TensorCores (harmless on single-TC v5e/v6e).
    if _round_up(B, tile_b) == tile_b and tile_b > SUBLANE:
        tile_b = _round_up((tile_b + 1) // 2, SUBLANE)
    B_pad = _round_up(B, tile_b)

    xp = x.astype(jnp.bfloat16)
    if B_pad != B:
        xp = jnp.pad(xp, ((0, B_pad - B), (0, 0)))

    grid = (B_pad // tile_b,)

    def const_spec(shape):
        # Weights / bias rows: same block every grid step -> stay resident in VMEM.
        return pl.BlockSpec(shape, lambda i: (0, 0))

    # VMEM budget: resident (double-buffered) weights + pipelined activation tiles + headroom,
    # capped at the actual device VMEM (v7x = 64 MiB per TensorCore).
    weight_bytes = sum(int(np.prod(v.shape)) * v.dtype.itemsize for v in folded.values())
    act_bytes = 2 * tile_b * (2 * in_size + 4 * (h1p + h2p + out_pad + output_size))
    try:
        vmem_cap = int(pltpu.get_tpu_info().vmem_capacity_bytes)
    except Exception:
        vmem_cap = 64 << 20  # safe lower bound (v7x)
    vmem_limit = int(min(vmem_cap - (4 << 20),
                         max(16 << 20, 2 * weight_bytes + act_bytes + (8 << 20))))

    flops = 2 * B_pad * (in_size * h1p + h1p * h2p + h2p * out_pad)
    bytes_accessed = B_pad * in_size * 2 + weight_bytes + B_pad * output_size * 4
    cost = pl.CostEstimate(flops=flops, transcendentals=0, bytes_accessed=bytes_accessed)

    out = pl.pallas_call(
        mlp_kernel,
        out_shape=jax.ShapeDtypeStruct((B_pad, output_size), jnp.float32),
        grid=grid,
        in_specs=[
            pl.BlockSpec((tile_b, in_size), lambda i: (i, 0)),  # x: pipelined over batch
            const_spec((in_size, h1p)),
            const_spec((1, h1p)),
            const_spec((h1p, h2p)),
            const_spec((1, h2p)),
            const_spec((h2p, out_pad)),
            const_spec((1, out_pad)),
        ],
        out_specs=pl.BlockSpec((tile_b, output_size), lambda i: (i, 0)),
        compiler_params=pltpu.CompilerParams(
            dimension_semantics=("parallel",),  # batch axis -> both TCs on v7x
            vmem_limit_bytes=vmem_limit,
        ),
        cost_estimate=cost,
    )(xp, folded["w1"], folded["c1"], folded["w2"], folded["c2"],
      folded["wo"], folded["bo"])

    return out[:B] if B_pad != B else out


# ----------------------------------------------------------------------------
# Parameters (mirror FeedforwardNN.__init__ shapes / init)
# ----------------------------------------------------------------------------
def make_params(key, input_size, hidden_sizes, output_size):
    """Raw parameters: Linear weights stored transposed (in, out), kaiming fan_in/relu init,
    zero biases (the module's _init_weights re-inits every Linear, incl. the output layer).
    BatchNorm params are deterministic eval-mode constants."""
    params = {}
    sizes = [input_size] + list(hidden_sizes)
    keys = jax.random.split(key, 2 * len(hidden_sizes) + 1)

    for i, (fan_in, fan_out) in enumerate(zip(sizes[:-1], sizes[1:])):
        std = np.sqrt(2.0 / fan_in)
        params[f"w{i+1}"] = std * jax.random.normal(keys[2 * i], (fan_in, fan_out), dtype=jnp.float32)
        params[f"b{i+1}"] = jnp.zeros((fan_out,), dtype=jnp.float32)
        params[f"gamma{i+1}"] = 1.0 + 0.05 * jax.random.normal(keys[2 * i + 1], (fan_out,), dtype=jnp.float32)
        params[f"beta{i+1}"] = jnp.full((fan_out,), 0.01, dtype=jnp.float32)
        params[f"mean{i+1}"] = jnp.zeros((fan_out,), dtype=jnp.float32)
        params[f"var{i+1}"] = jnp.ones((fan_out,), dtype=jnp.float32)

    fan_in = sizes[-1]
    std = np.sqrt(2.0 / fan_in)
    params["wo"] = std * jax.random.normal(keys[-1], (fan_in, output_size), dtype=jnp.float32)
    params["bo"] = jnp.zeros((output_size,), dtype=jnp.float32)
    return params


def fold_params(params, num_hidden, eps=1e-5):
    """Host-side constant folding: BN(eval) scale/shift + Linear bias folded into weights.
    Hidden and output widths zero-padded to multiples of 128 lanes (numerically exact:
    padded columns carry zero weight and zero folded bias, so ReLU keeps them at 0).
    Weights cast to bf16 for the MXU; folded biases stay f32."""
    folded = {}
    prev_pad = None
    for i in range(1, num_hidden + 1):
        w = params[f"w{i}"]
        scale = params[f"gamma{i}"] / jnp.sqrt(params[f"var{i}"] + eps)
        shift = params[f"beta{i}"] - params[f"mean{i}"] * scale
        wf = w * scale[None, :]
        cf = params[f"b{i}"] * scale + shift

        h = w.shape[1]
        h_pad = _round_up(h, LANE)
        if prev_pad is not None:  # match previous layer's padded output on the K dim
            wf = jnp.pad(wf, ((0, prev_pad - wf.shape[0]), (0, 0)))
        wf = jnp.pad(wf, ((0, 0), (0, h_pad - h)))
        cf = jnp.pad(cf, (0, h_pad - h))

        folded[f"w{i}"] = wf.astype(jnp.bfloat16)
        folded[f"c{i}"] = cf.reshape(1, -1).astype(jnp.float32)
        prev_pad = h_pad

    wo, bo = params["wo"], params["bo"]
    out_size = wo.shape[1]
    out_pad = _round_up(out_size, LANE)
    wo = jnp.pad(wo, ((0, prev_pad - wo.shape[0]), (0, out_pad - out_size)))
    bo = jnp.pad(bo, (0, out_pad - out_size))
    folded["wo"] = wo.astype(jnp.bfloat16)
    folded["bo"] = bo.reshape(1, -1).astype(jnp.float32)
    return folded


# ----------------------------------------------------------------------------
# Pure-JAX references
# ----------------------------------------------------------------------------
def feedforward_nn_ref(x, params, num_hidden, eps=1e-5):
    """Unfused full-f32 eval-mode reference (the module semantics)."""
    h = x
    for i in range(1, num_hidden + 1):
        h = h @ params[f"w{i}"] + params[f"b{i}"]
        h = (h - params[f"mean{i}"]) / jnp.sqrt(params[f"var{i}"] + eps)
        h = h * params[f"gamma{i}"] + params[f"beta{i}"]
        h = jnp.maximum(h, 0.0)
    return h @ params["wo"] + params["bo"]


def feedforward_nn_folded_ref(x, folded, output_size):
    """Mirrors the kernel's bf16-input / f32-accumulate math (tight-tolerance check)."""
    h = jnp.dot(x.astype(jnp.bfloat16), folded["w1"], preferred_element_type=jnp.float32)
    h = jnp.maximum(h + folded["c1"], 0.0)
    h = jnp.dot(h.astype(jnp.bfloat16), folded["w2"], preferred_element_type=jnp.float32)
    h = jnp.maximum(h + folded["c2"], 0.0)
    y = jnp.dot(h.astype(jnp.bfloat16), folded["wo"], preferred_element_type=jnp.float32)
    return (y + folded["bo"])[:, :output_size]


if __name__ == "__main__":
    input_size = 32
    hidden_sizes = [64, 64]
    output_size = 8
    batch = 8
    dropout_rate = 0.2  # identity in eval mode

    key = jax.random.PRNGKey(0)
    k_x, k_p = jax.random.split(key)
    x = jax.random.normal(k_x, (batch, input_size), dtype=jnp.float32)

    params = make_params(k_p, input_size, hidden_sizes, output_size)
    folded = fold_params(params, num_hidden=len(hidden_sizes))

    out = feedforward_nn_pallas(x, folded, output_size)
    out = jax.block_until_ready(out)

    # 1) Kernel matches the same bf16/f32-accumulate math exactly (up to accumulation order).
    ref_mixed = feedforward_nn_folded_ref(x, folded, output_size)
    np.testing.assert_allclose(np.asarray(out), np.asarray(ref_mixed), rtol=1e-3, atol=1e-3)

    # 2) Kernel matches the true f32 eval-mode module semantics (bf16 MXU inputs -> looser tol).
    ref_f32 = feedforward_nn_ref(x, params, num_hidden=len(hidden_sizes))
    np.testing.assert_allclose(np.asarray(out), np.asarray(ref_f32), rtol=5e-2, atol=1e-1)

    print("KERNEL_OK")
</pallas_src>

<mosaic_0001>
module attributes {stable_mosaic.version = 11 : i64} {
  func.func @mlp_kernel(%arg0: i32, %arg1: memref<8x32xbf16, #tpu.memory_space<vmem>>, %arg2: memref<32x128xbf16, #tpu.memory_space<vmem>>, %arg3: memref<1x128xf32, #tpu.memory_space<vmem>>, %arg4: memref<128x128xbf16, #tpu.memory_space<vmem>>, %arg5: memref<1x128xf32, #tpu.memory_space<vmem>>, %arg6: memref<128x128xbf16, #tpu.memory_space<vmem>>, %arg7: memref<1x128xf32, #tpu.memory_space<vmem>>, %arg8: memref<8x8xf32, #tpu.memory_space<vmem>>) attributes {dimension_semantics = [#tpu.dimension_semantics<parallel>], iteration_bounds = array<i64: 1>, scalar_prefetch = 0 : i64, scratch_operands = 0 : i64, tpu.core_type = #tpu.core_type<tc>, window_params = [{transform_indices = @transform_0, window_bounds = array<i64: 8, 32>}, {pipeline_mode = #tpu.pipeline_mode<synchronous>, transform_indices = @transform_1, window_bounds = array<i64: 32, 128>}, {pipeline_mode = #tpu.pipeline_mode<synchronous>, transform_indices = @transform_2, window_bounds = array<i64: 1, 128>}, {pipeline_mode = #tpu.pipeline_mode<synchronous>, transform_indices = @transform_3, window_bounds = array<i64: 128, 128>}, {pipeline_mode = #tpu.pipeline_mode<synchronous>, transform_indices = @transform_4, window_bounds = array<i64: 1, 128>}, {pipeline_mode = #tpu.pipeline_mode<synchronous>, transform_indices = @transform_5, window_bounds = array<i64: 128, 128>}, {pipeline_mode = #tpu.pipeline_mode<synchronous>, transform_indices = @transform_6, window_bounds = array<i64: 1, 128>}, {transform_indices = @transform_7, window_bounds = array<i64: 8, 8>}]} {
    %c0 = arith.constant 0 : index
    %c0_0 = arith.constant 0 : index
    %0 = vector.load %arg1[%c0, %c0_0] : memref<8x32xbf16, #tpu.memory_space<vmem>>, vector<8x32xbf16>
    %c0_1 = arith.constant 0 : index
    %c0_2 = arith.constant 0 : index
    %1 = vector.load %arg2[%c0_1, %c0_2] : memref<32x128xbf16, #tpu.memory_space<vmem>>, vector<32x128xbf16>
    %cst = arith.constant dense<0.000000e+00> : vector<8x128xf32>
    %2 = tpu.matmul %0, %1, %cst {dimension_numbers = #tpu.dot_dimension_numbers<[1], [0], [0], [1], [0, 0, 1, 1], [], []>} : vector<8x32xbf16>, vector<32x128xbf16>, vector<8x128xf32> -> vector<8x128xf32>
    %c0_3 = arith.constant 0 : index
    %c0_4 = arith.constant 0 : index
    %3 = vector.load %arg3[%c0_3, %c0_4] : memref<1x128xf32, #tpu.memory_space<vmem>>, vector<1x128xf32>
    %4 = vector.broadcast %3 : vector<1x128xf32> to vector<8x128xf32>
    %5 = arith.addf %2, %4 : vector<8x128xf32>
    %cst_5 = arith.constant 0.000000e+00 : f32
    %6 = vector.broadcast %cst_5 : f32 to vector<8x128xf32>
    %7 = arith.maximumf %5, %6 : vector<8x128xf32>
    %8 = arith.truncf %7 : vector<8x128xf32> to vector<8x128xbf16>
    %c0_6 = arith.constant 0 : index
    %c0_7 = arith.constant 0 : index
    %9 = vector.load %arg4[%c0_6, %c0_7] : memref<128x128xbf16, #tpu.memory_space<vmem>>, vector<128x128xbf16>
    %cst_8 = arith.constant dense<0.000000e+00> : vector<8x128xf32>
    %10 = tpu.matmul %8, %9, %cst_8 {dimension_numbers = #tpu.dot_dimension_numbers<[1], [0], [0], [1], [0, 0, 1, 1], [], []>} : vector<8x128xbf16>, vector<128x128xbf16>, vector<8x128xf32> -> vector<8x128xf32>
    %c0_9 = arith.constant 0 : index
    %c0_10 = arith.constant 0 : index
    %11 = vector.load %arg5[%c0_9, %c0_10] : memref<1x128xf32, #tpu.memory_space<vmem>>, vector<1x128xf32>
    %12 = vector.broadcast %11 : vector<1x128xf32> to vector<8x128xf32>
    %13 = arith.addf %10, %12 : vector<8x128xf32>
    %cst_11 = arith.constant 0.000000e+00 : f32
    %14 = vector.broadcast %cst_11 : f32 to vector<8x128xf32>
    %15 = arith.maximumf %13, %14 : vector<8x128xf32>
    %16 = arith.truncf %15 : vector<8x128xf32> to vector<8x128xbf16>
    %c0_12 = arith.constant 0 : index
    %c0_13 = arith.constant 0 : index
    %17 = vector.load %arg6[%c0_12, %c0_13] : memref<128x128xbf16, #tpu.memory_space<vmem>>, vector<128x128xbf16>
    %cst_14 = arith.constant dense<0.000000e+00> : vector<8x128xf32>
    %18 = tpu.matmul %16, %17, %cst_14 {dimension_numbers = #tpu.dot_dimension_numbers<[1], [0], [0], [1], [0, 0, 1, 1], [], []>} : vector<8x128xbf16>, vector<128x128xbf16>, vector<8x128xf32> -> vector<8x128xf32>
    %c0_15 = arith.constant 0 : index
    %c0_16 = arith.constant 0 : index
    %19 = vector.load %arg7[%c0_15, %c0_16] : memref<1x128xf32, #tpu.memory_space<vmem>>, vector<1x128xf32>
    %20 = vector.broadcast %19 : vector<1x128xf32> to vector<8x128xf32>
    %21 = arith.addf %18, %20 : vector<8x128xf32>
    %22 = vector.extract_strided_slice %21 {offsets = [0, 0], sizes = [8, 8], strides = [1, 1]} : vector<8x128xf32> to vector<8x8xf32>
    %c0_17 = arith.constant 0 : index
    %c0_18 = arith.constant 0 : index
    %23 = vector.load %arg8[%c0_17, %c0_18] : memref<8x8xf32, #tpu.memory_space<vmem>>, vector<8x8xf32>
    tpu.vector_store %arg8[%c0_17, %c0_18], %22 {strides = array<i32>} : memref<8x8xf32, #tpu.memory_space<vmem>>, vector<8x8xf32>,
    return
  }
  func.func @transform_0(%arg0: i32) -> (i32, i32) {
    %c0_i32 = arith.constant 0 : i32
    %c0_i32_0 = arith.constant 0 : i32
    return %arg0, %c0_i32 : i32, i32
  }
  func.func @transform_1(%arg0: i32) -> (i32, i32) {
    %c0_i32 = arith.constant 0 : i32
    %c0_i32_0 = arith.constant 0 : i32
    %c0_i32_1 = arith.constant 0 : i32
    return %c0_i32, %c0_i32_0 : i32, i32
  }
  func.func @transform_2(%arg0: i32) -> (i32, i32) {
    %c0_i32 = arith.constant 0 : i32
    %c0_i32_0 = arith.constant 0 : i32
    %c0_i32_1 = arith.constant 0 : i32
    return %c0_i32, %c0_i32_0 : i32, i32
  }
  func.func @transform_3(%arg0: i32) -> (i32, i32) {
    %c0_i32 = arith.constant 0 : i32
    %c0_i32_0 = arith.constant 0 : i32
    %c0_i32_1 = arith.constant 0 : i32
    return %c0_i32, %c0_i32_0 : i32, i32
  }
  func.func @transform_4(%arg0: i32) -> (i32, i32) {
    %c0_i32 = arith.constant 0 : i32
    %c0_i32_0 = arith.constant 0 : i32
    %c0_i32_1 = arith.constant 0 : i32
    return %c0_i32, %c0_i32_0 : i32, i32
  }
  func.func @transform_5(%arg0: i32) -> (i32, i32) {
    %c0_i32 = arith.constant 0 : i32
    %c0_i32_0 = arith.constant 0 : i32
    %c0_i32_1 = arith.constant 0 : i32
    return %c0_i32, %c0_i32_0 : i32, i32
  }
  func.func @transform_6(%arg0: i32) -> (i32, i32) {
    %c0_i32 = arith.constant 0 : i32
    %c0_i32_0 = arith.constant 0 : i32
    %c0_i32_1 = arith.constant 0 : i32
    return %c0_i32, %c0_i32_0 : i32, i32
  }
  func.func @transform_7(%arg0: i32) -> (i32, i32) {
    %c0_i32 = arith.constant 0 : i32
    %c0_i32_0 = arith.constant 0 : i32
    return %arg0, %c0_i32 : i32, i32
  }
}

</mosaic_0001>

<bundles_post_ra>
// kernel: tpu_custom_call.1
= control target key start
LH: loop header
LB: loop body
LE: loop exit
PB: predicated region body
PF: predicated region fallthrough
CT: control target
= control target key end

     0   :  { %12 = vsyncpa [#allocation3], 0  ;;  %s781_s0 = inlined_call_operand.hbm [shape: bf16[8,32], index: 0, kind: input, shape index: {}]   ;;  %s782_s1 = inlined_call_operand.hbm [shape: bf16[32,128], index: 1, kind: input, shape index: {}]   ;;  %s783_s2 = inlined_call_operand.vmem [shape: f32[1,128], index: 2, kind: input, shape index: {}]   ;;  %s784_s3 = inlined_call_operand.hbm [shape: bf16[128,128], index: 3, kind: input, shape index: {}]   ;;  %s785_s4 = inlined_call_operand.vmem [shape: f32[1,128], index: 4, kind: input, shape index: {}]   ;;  %s786_s5 = inlined_call_operand.hbm [shape: bf16[128,128], index: 5, kind: input, shape index: {}]   ;;  %s787_s6 = inlined_call_operand.vmem [shape: f32[1,128], index: 6, kind: input, shape index: {}]   ;;  %s788_s7 = inlined_call_operand.hbm [shape: f32[8,8], index: 7, kind: output, shape index: {}]  }
   0x1   :  { %13 = vsyncpa [#allocation6], 0 }
   0x2   :  { %14 = vsyncpa [#allocation9], 0 }
   0x3   :  { %15 = vsyncpa [#allocation4], 0  ;;  %s630_s24 = smov [#allocation5]   ;;  %s512_s28 = scalar_lea.hbm %s782_s1, 256 }
   0x4   :  { %s31_s25 = sshll.u32 %s630_s24, 4  ;;  %p513_p0 = scmp.ne.s32.totalorder %s782_s1, %s512_s28  ;;  %s32_s25 = int_to_ptr.vmem [resolvable:$true] %s31_s25 }
   0x5   :  { %p516_p1 = scmp.lt.u32.totalorder %s512_s28, %s782_s1 }
   0x7   :  { %p518_p2 = pnand %p516_p1, %p513_p0 }
   0x9   :  { %521 = shalt.err (!%p518_p2)
}
   0xa   :  { %s522_s10 = scalar_lea.vmem %s32_s25, 256  ;;  %p527_p4 = scmp.lt.s32.totalorder %s32_s25, %s32_s25 }
   0xb   :  { %p523_p3 = scmp.ne.s32.totalorder %s32_s25, %s522_s10  ;;  %p528_p5 = scmp.lt.s32.totalorder %s522_s10, %s522_s10 }
   0xd   :  { %p529_p6 = por %p528_p5, %p527_p4 }
   0xf   :  { %p530_p7 = pnand %p529_p6, %p523_p3 }
  0x11   :  { %533 = shalt.err (!%p530_p7)
}
  0x12   :  { %s631_s11 = smov 64   ;;  %s632_s12 = smov 4  }
  0x13   :  { %37 = dma.hbm_to_vmem [thread:$0]  %s782_s1, 256, %s32_s25, [#allocation6], %s631_s11, %s631_s11, %s632_s12  }
  0x14   :  { %s633_s15 = smov [#allocation2]   ;;  %s634_s17 = smov [#allocation7]  }
  0x15   :  { %s22_s16 = sshll.u32 %s633_s15, 4  ;;  %s45_s18 = sshll.u32 %s634_s17, 4  ;;  %s23_s16 = int_to_ptr.vmem [resolvable:$true] %s22_s16  ;;  %s46_s18 = int_to_ptr.vmem [resolvable:$true] %s45_s18 }
  0x16   :  { %s534_s21 = scalar_lea.hbm %s781_s0, 64 }
  0x17   :  { %p535_p8 = scmp.ne.s32.totalorder %s781_s0, %s534_s21  ;;  %p538_p9 = scmp.lt.u32.totalorder %s534_s21, %s781_s0 }
  0x19   :  { %p540_p10 = pnand %p538_p9, %p535_p8 }
  0x1b   :  { %543 = shalt.err (!%p540_p10)
}
  0x1c   :  { %s544_s1 = scalar_lea.vmem %s23_s16, 64  ;;  %p549_p12 = scmp.lt.s32.totalorder %s23_s16, %s23_s16 }
  0x1d   :  { %p545_p11 = scmp.ne.s32.totalorder %s23_s16, %s544_s1  ;;  %p550_p13 = scmp.lt.s32.totalorder %s544_s1, %s544_s1 }
  0x1f   :  { %p551_p0 = por %p550_p13, %p549_p12 }
  0x21   :  { %p552_p1 = pnand %p551_p0, %p545_p11 }
  0x23   :  { %555 = shalt.err (!%p552_p1)
}
  0x24   :  { %25 = dma.hbm_to_vmem [thread:$0]  %s781_s0, 64, %s23_s16, [#allocation3]  }
  0x25   :  { %s556_s30 = scalar_lea.hbm %s784_s3, 1024 }
  0x26   :  { %p557_p2 = scmp.ne.s32.totalorder %s784_s3, %s556_s30  ;;  %p560_p3 = scmp.lt.u32.totalorder %s556_s30, %s784_s3 }
  0x28   :  { %p562_p4 = pnand %p560_p3, %p557_p2 }
  0x2a   :  { %565 = shalt.err (!%p562_p4)
}
  0x2b   :  { %s566_s14 = scalar_lea.vmem %s46_s18, 1024  ;;  %p571_p6 = scmp.lt.s32.totalorder %s46_s18, %s46_s18 }
  0x2c   :  { %p567_p5 = scmp.ne.s32.totalorder %s46_s18, %s566_s14  ;;  %p572_p7 = scmp.lt.s32.totalorder %s566_s14, %s566_s14 }
  0x2e   :  { %p573_p8 = por %p572_p7, %p571_p6 }
  0x30   :  { %p574_p9 = pnand %p573_p8, %p567_p5 }
  0x32   :  { %577 = shalt.err (!%p574_p9)
}
  0x33   :  { %51 = dma.hbm_to_vmem [thread:$0]  %s784_s3, 1024, %s46_s18, [#allocation6], %s631_s11, %s631_s11, %s632_s12  }
  0x34   :  { %s635_s16 = smov [#allocation8]   ;;  %s578_s21 = scalar_lea.hbm %s786_s5, 1024 }
  0x35   :  { %s59_s17 = sshll.u32 %s635_s16, 4  ;;  %p579_p10 = scmp.ne.s32.totalorder %s786_s5, %s578_s21  ;;  %s60_s17 = int_to_ptr.vmem [resolvable:$true] %s59_s17 }
  0x36   :  { %p582_p11 = scmp.lt.u32.totalorder %s578_s21, %s786_s5 }
  0x38   :  { %p584_p12 = pnand %p582_p11, %p579_p10 }
  0x3a   :  { %587 = shalt.err (!%p584_p12)
}
  0x3b   :  { %s588_s1 = scalar_lea.vmem %s60_s17, 1024  ;;  %p593_p0 = scmp.lt.s32.totalorder %s60_s17, %s60_s17 }
  0x3c   :  { %p589_p13 = scmp.ne.s32.totalorder %s60_s17, %s588_s1  ;;  %p594_p1 = scmp.lt.s32.totalorder %s588_s1, %s588_s1 }
  0x3e   :  { %p595_p2 = por %p594_p1, %p593_p0 }
  0x40   :  { %p596_p3 = pnand %p595_p2, %p589_p13 }
  0x42   :  { %599 = shalt.err (!%p596_p3)
}
  0x43   :  { %65 = dma.hbm_to_vmem [thread:$0]  %s786_s5, 1024, %s60_s17, [#allocation9], %s631_s11, %s631_s11, %s632_s12  }
  0x44   :  { %622 = dma.done.wait [#allocation3], 64  }
  0x45   :  { %623 = vsyncadd [#allocation3], 4294967232 }
  0x46   :  { %624 = dma.done.wait [#allocation6], 1280  }
  0x47   :  { %625 = vsyncadd [#allocation6], 4294966016 }
  0x48   :  { %626 = dma.done.wait [#allocation9], 1024  }
  0x49   :  { %627 = vsyncadd [#allocation9], 4294966272  ;;  %v636_v0 = vmov 0.0   ;;  %vm637_vm0 = vmmov 0   ;;  %v494_v1 = vld [vmem:[#allocation5] sm:$0xff]   ;;  %v495_v2 = vld [vmem:[#allocation5 + $0x8] sm:$0xff]  }
  0x4a   :  { %437 = vmatprep.subr.bf16.mxu0 %v636_v0  ;;  %441 = vmatprep.mubr.msk.bf16.mxu0 %vm637_vm0, %v636_v0  ;;  %v496_v3 = vld [vmem:[#allocation7] sm:$0xff]   ;;  %vm105_vm1 = vcmask 261120   ;;  %v497_v4 = vld [vmem:[#allocation7 + $0x8] sm:$0xff]   ;;  %v498_v6 = vld [vmem:[#allocation7 + $0x10] sm:$0xff]   ;;  %s638_s28 = smov [#allocation10]   ;;  %vm375_vm2 = vcmask 64512  }
  0x4b   :  { %445 = vmatprep.subr.bf16.mxu1 %v636_v0  ;;  %461 = vmatprep.mubr.msk.bf16.mxu1 %vm637_vm0, %v636_v0  ;;  %v81_v5 = vld [vmem:[#allocation2] sm:$0xf]  ;;  %v499_v7 = vld [vmem:[#allocation7 + $0x18] sm:$0xff]   ;;  %v500_v8 = vld [vmem:[#allocation7 + $0x20] sm:$0xff]   ;;  %s383_s29 = sshll.u32 %s638_s28, 4  ;;  %s384_s29 = int_to_ptr.vmem [resolvable:$true] %s383_s29 }
  0x4c   :  { %438 = vmatpush3.bf16.msra.mxu0 %v494_v1  ;;  %446 = vmatpush3.bf16.msra.mxu1 %v496_v3  ;;  %v501_v9 = vld [vmem:[#allocation7 + $0x28] sm:$0xff]   ;;  %v502_v10 = vld [vmem:[#allocation7 + $0x30] sm:$0xff]   ;;  %v503_v11 = vld [vmem:[#allocation7 + $0x38] sm:$0xff]   ;;  %p605_p5 = scmp.lt.s32.totalorder %s384_s29, %s384_s29 }
  0x4d   :  { %439 = vmatprep.subr.bf16.mxu0 %v636_v0  ;;  %447 = vmatprep.subr.bf16.mxu1 %v636_v0  ;;  %v504_v12 = vld [vmem:[#allocation8] sm:$0xff]   ;;  %v505_v13 = vld [vmem:[#allocation8 + $0x8] sm:$0xff]   ;;  %v506_v14 = vld [vmem:[#allocation8 + $0x10] sm:$0xff]  }
  0x4e   :  { %v507_v15 = vld [vmem:[#allocation8 + $0x18] sm:$0xff]   ;;  %v508_v16 = vld [vmem:[#allocation8 + $0x20] sm:$0xff]   ;;  %v509_v17 = vld [vmem:[#allocation8 + $0x28] sm:$0xff]  }
  0x4f   :  { %v394_v18 = vld [vmem:[%s783_s2] ss:$0 sm:$0xff]  ;;  %v510_v26 = vld [vmem:[#allocation8 + $0x30] sm:$0xff]   ;;  %v511_v27 = vld [vmem:[#allocation8 + $0x38] sm:$0xff]  }
  0x50   :  { %440 = vmatpush3.bf16.msra.mxu0 %v495_v2  ;;  %448 = vmatpush3.bf16.msra.mxu1 %v497_v4  ;;  %v398_v28 = vld [vmem:[%s785_s4] ss:$0 sm:$0xff]  ;;  %s600_s4 = scalar_lea.vmem %s384_s29, 128 }
  0x51   :  { %465 = vmatprep.subr.bf16.mxu0 %v636_v0  ;;  %449 = vmatprep.subr.bf16.mxu1 %v636_v0  ;;  %v407_v36 = vld [vmem:[%s787_s6] ss:$0 sm:$0xff]  ;;  %p601_p4 = scmp.ne.s32.totalorder %s384_s29, %s600_s4  ;;  %p606_p6 = scmp.lt.s32.totalorder %s600_s4, %s600_s4 }
  0x53   :  { %442 = vmatmul.mubr.msk.bf16.vlgmr.msra.gmra.mrb[0].mxu0 %vm105_vm1, %v81_v5  ;;  %p607_p7 = por %p606_p6, %p605_p5 }
  0x54   :  { %481 = vmatprep.mubr.msk.bf16.mxu0 %vm637_vm0, %v636_v0  ;;  %450 = vmatpush3.bf16.msra.mxu1 %v498_v6 }
  0x55   :  { %451 = vmatprep.subr.bf16.mxu1 %v636_v0  ;;  %466 = vmatpush3.bf16.msra.mxu0 %v504_v12  ;;  %p608_p8 = pnand %p607_p7, %p601_p4 }
  0x56   :  { %467 = vmatprep.subr.bf16.mxu0 %v636_v0 }
  0x58   :  { %452 = vmatpush3.bf16.msra.mxu1 %v499_v7 }
  0x59   :  { %453 = vmatprep.subr.bf16.mxu1 %v636_v0  ;;  %468 = vmatpush3.bf16.msra.mxu0 %v505_v13 }
  0x5a   :  { %469 = vmatprep.subr.bf16.mxu0 %v636_v0 }
  0x5c   :  { %454 = vmatpush3.bf16.msra.mxu1 %v500_v8 }
  0x5d   :  { %455 = vmatprep.subr.bf16.mxu1 %v636_v0  ;;  %470 = vmatpush3.bf16.msra.mxu0 %v506_v14 }
  0x5e   :  { %471 = vmatprep.subr.bf16.mxu0 %v636_v0 }
  0x60   :  { %456 = vmatpush3.bf16.msra.mxu1 %v501_v9 }
  0x61   :  { %457 = vmatprep.subr.bf16.mxu1 %v636_v0  ;;  %472 = vmatpush3.bf16.msra.mxu0 %v507_v15 }
  0x62   :  { %473 = vmatprep.subr.bf16.mxu0 %v636_v0 }
  0x64   :  { %458 = vmatpush3.bf16.msra.mxu1 %v502_v10 }
  0x65   :  { %459 = vmatprep.subr.bf16.mxu1 %v636_v0  ;;  %474 = vmatpush3.bf16.msra.mxu0 %v508_v16 }
  0x66   :  { %475 = vmatprep.subr.bf16.mxu0 %v636_v0 }
  0x68   :  { %460 = vmatpush3.bf16.msra.mxu1 %v503_v11 }
  0x69   :  { %476 = vmatpush3.bf16.msra.mxu0 %v509_v17 }
  0x6a   :  { %477 = vmatprep.subr.bf16.mxu0 %v636_v0 }
  0x6d   :  { %478 = vmatpush3.bf16.msra.mxu0 %v510_v26 }
  0x6e   :  { %479 = vmatprep.subr.bf16.mxu0 %v636_v0 }
  0x71   :  { %480 = vmatpush3.bf16.msra.mxu0 %v511_v27 }
 0x126   :  { %v143_v19 = vpop.f32.mrb[0].mxu0 }
 0x127   :  { %v144_v20 = vadd.f32 %v394_v18, %v143_v19  ;;  %v443_v21 = vpop.f32.mrb[1].mxu0 }
 0x128   :  { %v146_v22 = vpop.f32.mrb[2].mxu0 }
 0x129   :  { %v149_v23 = vmax.f32 %v144_v20, 0.0  ;;  %v444_v24 = vpop.f32.mrb[3].mxu0 }
 0x12b   :  { %v150_v25 = vpack.c.bf16 %v149_v23, %v149_v23 }
 0x12d   :  { %462 = vmatmul.mubr.bf16.vlgmr.msra.gmra.mrb[0].mxu1 %v150_v25 }
 0x200   :  { %v256_v29 = vpop.f32.mrb[0].mxu1 }
 0x201   :  { %v257_v30 = vadd.f32 %v398_v28, %v256_v29  ;;  %v463_v31 = vpop.f32.mrb[1].mxu1 }
 0x202   :  { %v259_v32 = vpop.f32.mrb[2].mxu1 }
 0x203   :  { %v262_v33 = vmax.f32 %v257_v30, 0.0  ;;  %v464_v34 = vpop.f32.mrb[3].mxu1 }
 0x205   :  { %v263_v35 = vpack.c.bf16 %v262_v33, %v262_v33 }
 0x207   :  { %482 = vmatmul.mubr.bf16.vlgmr.msra.gmra.mrb[4].mxu0 %v263_v35 }
 0x2da   :  { %v369_v37 = vpop.f32.mrb[4].mxu0 }
 0x2db   :  { %v370_v38 = vadd.f32 %v407_v36, %v369_v37  ;;  %v483_v39 = vpop.f32.mrb[5].mxu0 }
 0x2dc   :  { %v372_v40 = vpop.f32.mrb[6].mxu0 }
 0x2dd   :  { %v484_v41 = vpop.f32.mrb[7].mxu0  ;;  %376 = vst.msk [vmem:[#allocation10] sm:$0xff] %vm375_vm2, %v370_v38 }
 0x2de   :  { %611 = shalt.err (!%p608_p8)
}
 0x2df   :  { %s612_s6 = scalar_lea.hbm %s788_s7, 128 }
 0x2e0   :  { %p613_p9 = scmp.ne.s32.totalorder %s788_s7, %s612_s6  ;;  %p616_p10 = scmp.lt.u32.totalorder %s612_s6, %s788_s7 }
 0x2e2   :  { %p618_p11 = pnand %p616_p10, %p613_p9 }
 0x2e4   :  { %621 = shalt.err (!%p618_p11)
}
 0x2e5   :  { %386 = dma.vmem_to_hbm [thread:$0]  %s384_s29, 128, %s788_s7, [#allocation4]  }
 0x2e6   :  { %628 = dma.done.wait [#allocation4], 128  }
 0x2e7   :  { %629 = vsyncadd [#allocation4], 4294967168 }
 0x2e8   :  { %390 = vsyncpa [#allocation3], 1 }
 0x2e9   :  { %391 = vsyncpa [#allocation6], 1 }
 0x2ea   :  { %392 = vsyncpa [#allocation9], 1 }
 0x2eb   :  { %393 = vsyncpa [#allocation4], 1 }

</bundles_post_ra>
